<compile_context>
chip_gen: v7x
topology: tpu7x:2x2x1
jax: 0.10.0
libtpu: 0.0.40
codegen_flags: <defaults>
</compile_context>

<pallas_src>
import functools

import jax
import jax.numpy as jnp
import numpy as np
from jax.experimental import pallas as pl
from jax.experimental.pallas import tpu as pltpu

_BN_EPS = 1e-5


def _round_up(a, b):
    return (a + b - 1) // b * b


# ----------------- Pass 1: per-tile partial BN batch statistics ---------------
def _conv_stats_kernel(w_ref, patches_ref, sum_ref, ssq_ref):
    """Per-tile sum / sum-of-squares of the conv output, lane-broadcast."""
    conv = jnp.dot(w_ref[...], patches_ref[...],
                   preferred_element_type=jnp.float32)          # (Cc, m_tile) f32
    s = jnp.sum(conv, axis=1, keepdims=True)                    # (Cc, 1)
    q = jnp.sum(conv * conv, axis=1, keepdims=True)             # (Cc, 1)
    sum_ref[...] = jnp.broadcast_to(s, sum_ref.shape)           # (Cc, 128)
    ssq_ref[...] = jnp.broadcast_to(q, ssq_ref.shape)


# --------- Pass 2: conv (BN scale folded) + shift + PReLU + pool max ----------
def _fuse_kernel(w_ref, par_ref, patches_ref, out_ref):
    conv = jnp.dot(w_ref[...], patches_ref[...],
                   preferred_element_type=jnp.float32)          # (Cc, m_tile)
    shift = par_ref[:, 0:1]                                     # beta - mean*scale
    alpha = par_ref[:, 1:2]                                     # PReLU slope
    y = conv + shift                                            # BN (scale in weights)
    y = jnp.where(y >= 0.0, y, alpha * y)                       # PReLU

    # MaxPool2d(2,2) taps == conv taps (kh,kw) in {1,2}x{1,2} -> patches rows.
    p = patches_ref[...]
    cin = p.shape[0] // 9
    mx = jnp.maximum(
        jnp.maximum(p[4 * cin:5 * cin], p[5 * cin:6 * cin]),
        jnp.maximum(p[7 * cin:8 * cin], p[8 * cin:9 * cin])).astype(jnp.float32)

    # Single lane-dense full-tile store: rows 0:Cc = main, Cc:Cout = pool.
    out_ref[...] = jnp.concatenate([y, mx], axis=0).astype(out_ref.dtype)


@functools.partial(jax.jit, static_argnames=("m_tile",))
def initial_block_forward(x_nchw, w_conv, gamma, beta, alpha, *, m_tile=8192):
    """x_nchw: (N, Cin, H, W) f32.  w_conv: (Cc, Cin, 3, 3) PyTorch OIHW."""
    N, Cin, H, W = x_nchw.shape
    if H % 2 or W % 2:
        raise ValueError("InitialBlock requires even H, W (conv and pool halve them).")
    Cc = w_conv.shape[0]
    Cout = Cc + Cin
    OH, OW = H // 2, W // 2
    M_img = OH * OW                         # per-image spatial extent (lane axis)
    count = jnp.float32(N * M_img)          # BN batch-stat element count

    # Lane tile over the per-image spatial axis; zero-pad it to a tile multiple.
    m_tile = _round_up(max(128, min(m_tile, _round_up(M_img, 128))), 128)
    M_pad = _round_up(M_img, m_tile)
    n_tiles = M_pad // m_tile
    n_blocks = N * n_tiles

    x = x_nchw.astype(jnp.float32)
    xp = jnp.pad(x, ((0, 0), (0, 0), (1, 1), (1, 1)))

    # im2col, batch-major so pass 2 writes (N, Cout, OH*OW) directly (no NCHW
    # transpose afterwards).  bf16 on the wire; zero columns pad each image.
    # TODO(synk): build these 9 taps in-kernel from a halo'd x tile to drop
    # this HBM round trip (patches is written once and read by both passes).
    taps = [xp[:, :, kh:kh + 2 * OH:2, kw:kw + 2 * OW:2]
            for kh in range(3) for kw in range(3)]
    patches = jnp.transpose(jnp.stack(taps, axis=0), (1, 0, 2, 3, 4))
    patches = patches.reshape(N, 9 * Cin, M_img).astype(jnp.bfloat16)
    patches = jnp.pad(patches, ((0, 0), (0, 0), (0, M_pad - M_img)))

    # conv weight OIHW -> (Cc, kh, kw, Cin) -> (Cc, 9*Cin); rows match patches.
    w2 = jnp.transpose(w_conv, (0, 2, 3, 1)).reshape(Cc, 9 * Cin).astype(jnp.float32)

    # --- pass 1: per-tile partial batch statistics (both axes parallel) ------
    psum, pssq = pl.pallas_call(
        _conv_stats_kernel,
        out_shape=(jax.ShapeDtypeStruct((Cc, n_blocks * 128), jnp.float32),
                   jax.ShapeDtypeStruct((Cc, n_blocks * 128), jnp.float32)),
        grid=(N, n_tiles),
        in_specs=[pl.BlockSpec((Cc, 9 * Cin), lambda n, j: (0, 0)),
                  pl.BlockSpec((None, 9 * Cin, m_tile), lambda n, j: (n, 0, j))],
        out_specs=(pl.BlockSpec((Cc, 128), lambda n, j: (0, n * n_tiles + j)),
                   pl.BlockSpec((Cc, 128), lambda n, j: (0, n * n_tiles + j))),
        compiler_params=pltpu.CompilerParams(
            dimension_semantics=("parallel", "parallel")),
    )(w2.astype(jnp.bfloat16), patches)

    # Zero-padded columns contribute nothing (bias-free conv of zeros == 0), so
    # divide by the true count.  Lanes within each partial block are identical.
    csum = jnp.sum(psum[:, ::128], axis=1)
    cssq = jnp.sum(pssq[:, ::128], axis=1)
    mean = csum / count
    var = jnp.maximum(cssq / count - mean * mean, 0.0)   # biased var, training BN
    scale = gamma.astype(jnp.float32) * jax.lax.rsqrt(var + _BN_EPS)
    shift = beta.astype(jnp.float32) - mean * scale

    # Fold BN scale into conv weights; ship only (shift, alpha) per channel.
    w2_scaled = (w2 * scale[:, None]).astype(jnp.bfloat16)
    alpha_col = jnp.broadcast_to(
        jnp.asarray(alpha, jnp.float32).reshape(-1, 1), (Cc, 1))
    params = jnp.concatenate([shift[:, None], alpha_col], axis=1)   # (Cc, 2)

    # --- pass 2: streaming conv + shift + PReLU + pool max -------------------
    out3d = pl.pallas_call(
        _fuse_kernel,
        out_shape=jax.ShapeDtypeStruct((N, Cout, M_pad), x.dtype),
        grid=(N, n_tiles),
        in_specs=[pl.BlockSpec((Cc, 9 * Cin), lambda n, j: (0, 0)),
                  pl.BlockSpec((Cc, 2), lambda n, j: (0, 0)),
                  pl.BlockSpec((None, 9 * Cin, m_tile), lambda n, j: (n, 0, j))],
        out_specs=pl.BlockSpec((None, Cout, m_tile), lambda n, j: (n, 0, j)),
        compiler_params=pltpu.CompilerParams(
            dimension_semantics=("parallel", "parallel")),
    )(w2_scaled, params, patches)

    # Layout-free reshape when OH*OW is already a lane multiple; otherwise a
    # cheap contiguous pad-slice.  No NCHW transpose.
    return out3d[:, :, :M_img].reshape(N, Cout, OH, OW)


def reference_forward(x, w, gamma, beta, alpha):
    """Pure-JAX reference replicating the PyTorch forward (training-mode BN)."""
    conv = jax.lax.conv_general_dilated(
        x, w, window_strides=(2, 2), padding=((1, 1), (1, 1)),
        dimension_numbers=("NCHW", "OIHW", "NCHW"),
        precision=jax.lax.Precision.HIGHEST)
    mean = jnp.mean(conv, axis=(0, 2, 3), keepdims=True)
    var = jnp.mean((conv - mean) ** 2, axis=(0, 2, 3), keepdims=True)
    y = (conv - mean) / jnp.sqrt(var + _BN_EPS)
    y = y * gamma.reshape(1, -1, 1, 1) + beta.reshape(1, -1, 1, 1)
    y = jnp.where(y >= 0, y, alpha * y)
    mx = jax.lax.reduce_window(x, -jnp.inf, jax.lax.max,
                               (1, 1, 2, 2), (1, 1, 2, 2), "VALID")
    return jnp.concatenate([y, mx], axis=1)


if __name__ == "__main__":
    key = jax.random.PRNGKey(0)
    k1, k2, k3, k4 = jax.random.split(key, 4)

    # InitialBlock(input_ch=3, output_ch=16): conv -> 13 channels, pool -> 3.
    N, Cin, H, W = 2, 3, 32, 32
    output_ch = 16
    Cc = output_ch - 3

    x = jax.random.normal(k1, (N, Cin, H, W), jnp.float32)
    w_conv = 0.1 * jax.random.normal(k2, (Cc, Cin, 3, 3), jnp.float32)
    gamma = 1.0 + 0.1 * jax.random.normal(k3, (Cc,), jnp.float32)   # BN weight
    beta = 0.1 * jax.random.normal(k4, (Cc,), jnp.float32)          # BN bias
    alpha = jnp.float32(0.25)                                       # PReLU default

    # m_tile=128 -> per image OH*OW=256 splits into 2 tiles, grid=(2, 2):
    # exercises the tiled per-image path and the partial-sum reduction.
    out = initial_block_forward(x, w_conv, gamma, beta, alpha, m_tile=128)
    out = jax.block_until_ready(out)

    assert out.shape == (N, output_ch, H // 2, W // 2), out.shape
    ref = reference_forward(x, w_conv, gamma, beta, alpha)
    np.testing.assert_allclose(np.asarray(out), np.asarray(ref),
                               rtol=2e-2, atol=2e-2)
    print("KERNEL_OK")
</pallas_src>

<mosaic_0001>
module attributes {stable_mosaic.version = 11 : i64} {
  func.func @_conv_stats_kernel(%arg0: i32, %arg1: i32, %arg2: memref<13x27xbf16, #tpu.memory_space<vmem>>, %arg3: memref<1x27x128xbf16, #tpu.memory_space<vmem>>, %arg4: memref<13x128xf32, #tpu.memory_space<vmem>>, %arg5: memref<13x128xf32, #tpu.memory_space<vmem>>) attributes {dimension_semantics = [#tpu.dimension_semantics<parallel>, #tpu.dimension_semantics<parallel>], iteration_bounds = array<i64: 2, 2>, scalar_prefetch = 0 : i64, scratch_operands = 0 : i64, tpu.core_type = #tpu.core_type<tc>, window_params = [{pipeline_mode = #tpu.pipeline_mode<synchronous>, transform_indices = @transform_0, window_bounds = array<i64: 13, 27>}, {transform_indices = @transform_1, window_bounds = array<i64: 1, 27, 128>}, {transform_indices = @transform_2, window_bounds = array<i64: 13, 128>}, {transform_indices = @transform_3, window_bounds = array<i64: 13, 128>}]} {
    %c0 = arith.constant 0 : index
    %c0_0 = arith.constant 0 : index
    %0 = vector.load %arg2[%c0, %c0_0] : memref<13x27xbf16, #tpu.memory_space<vmem>>, vector<13x27xbf16>
    %c0_1 = arith.constant 0 : index
    %c0_2 = arith.constant 0 : index
    %c0_3 = arith.constant 0 : index
    %1 = vector.load %arg3[%c0_1, %c0_2, %c0_3] : memref<1x27x128xbf16, #tpu.memory_space<vmem>>, vector<1x27x128xbf16>
    %2 = vector.shape_cast %1 : vector<1x27x128xbf16> to vector<27x128xbf16>
    %cst = arith.constant dense<0.000000e+00> : vector<13x128xf32>
    %3 = tpu.matmul %0, %2, %cst {dimension_numbers = #tpu.dot_dimension_numbers<[1], [0], [0], [1], [0, 0, 1, 1], [], []>} : vector<13x27xbf16>, vector<27x128xbf16>, vector<13x128xf32> -> vector<13x128xf32>
    %cst_4 = arith.constant dense<0.000000e+00> : vector<13xf32>
    %4 = vector.multi_reduction <add>, %3, %cst_4 [1] : vector<13x128xf32> to vector<13xf32>
    %5 = vector.shape_cast %4 : vector<13xf32> to vector<13x1xf32>
    %6 = arith.mulf %3, %3 : vector<13x128xf32>
    %cst_5 = arith.constant dense<0.000000e+00> : vector<13xf32>
    %7 = vector.multi_reduction <add>, %6, %cst_5 [1] : vector<13x128xf32> to vector<13xf32>
    %8 = vector.shape_cast %7 : vector<13xf32> to vector<13x1xf32>
    %9 = vector.shape_cast %5 : vector<13x1xf32> to vector<13x1xf32>
    %10 = vector.broadcast %9 : vector<13x1xf32> to vector<13x128xf32>
    %c0_6 = arith.constant 0 : index
    %c0_7 = arith.constant 0 : index
    %11 = vector.load %arg4[%c0_6, %c0_7] : memref<13x128xf32, #tpu.memory_space<vmem>>, vector<13x128xf32>
    tpu.vector_store %arg4[%c0_6, %c0_7], %10 {strides = array<i32>} : memref<13x128xf32, #tpu.memory_space<vmem>>, vector<13x128xf32>,
    %12 = vector.shape_cast %8 : vector<13x1xf32> to vector<13x1xf32>
    %13 = vector.broadcast %12 : vector<13x1xf32> to vector<13x128xf32>
    %c0_8 = arith.constant 0 : index
    %c0_9 = arith.constant 0 : index
    %14 = vector.load %arg5[%c0_8, %c0_9] : memref<13x128xf32, #tpu.memory_space<vmem>>, vector<13x128xf32>
    tpu.vector_store %arg5[%c0_8, %c0_9], %13 {strides = array<i32>} : memref<13x128xf32, #tpu.memory_space<vmem>>, vector<13x128xf32>,
    return
  }
  func.func @transform_0(%arg0: i32, %arg1: i32) -> (i32, i32) {
    %c0_i32 = arith.constant 0 : i32
    %c0_i32_0 = arith.constant 0 : i32
    %c0_i32_1 = arith.constant 0 : i32
    return %c0_i32, %c0_i32_0 : i32, i32
  }
  func.func @transform_1(%arg0: i32, %arg1: i32) -> (i32, i32, i32) {
    %c0_i32 = arith.constant 0 : i32
    %c0_i32_0 = arith.constant 0 : i32
    return %arg0, %c0_i32, %arg1 : i32, i32, i32
  }
  func.func @transform_2(%arg0: i32, %arg1: i32) -> (i32, i32) {
    %c2_i32 = arith.constant 2 : i32
    %0 = arith.muli %arg0, %c2_i32 : i32
    %1 = arith.addi %0, %arg1 : i32
    %c0_i32 = arith.constant 0 : i32
    %c0_i32_0 = arith.constant 0 : i32
    return %c0_i32, %1 : i32, i32
  }
  func.func @transform_3(%arg0: i32, %arg1: i32) -> (i32, i32) {
    %c2_i32 = arith.constant 2 : i32
    %0 = arith.muli %arg0, %c2_i32 : i32
    %1 = arith.addi %0, %arg1 : i32
    %c0_i32 = arith.constant 0 : i32
    %c0_i32_0 = arith.constant 0 : i32
    return %c0_i32, %1 : i32, i32
  }
}

module attributes {stable_mosaic.version = 11 : i64} {
  func.func @_fuse_kernel(%arg0: i32, %arg1: i32, %arg2: memref<13x27xbf16, #tpu.memory_space<vmem>>, %arg3: memref<13x2xf32, #tpu.memory_space<vmem>>, %arg4: memref<1x27x128xbf16, #tpu.memory_space<vmem>>, %arg5: memref<1x16x128xf32, #tpu.memory_space<vmem>>) attributes {dimension_semantics = [#tpu.dimension_semantics<parallel>, #tpu.dimension_semantics<parallel>], iteration_bounds = array<i64: 2, 2>, scalar_prefetch = 0 : i64, scratch_operands = 0 : i64, tpu.core_type = #tpu.core_type<tc>, window_params = [{pipeline_mode = #tpu.pipeline_mode<synchronous>, transform_indices = @transform_0, window_bounds = array<i64: 13, 27>}, {pipeline_mode = #tpu.pipeline_mode<synchronous>, transform_indices = @transform_1, window_bounds = array<i64: 13, 2>}, {transform_indices = @transform_2, window_bounds = array<i64: 1, 27, 128>}, {transform_indices = @transform_3, window_bounds = array<i64: 1, 16, 128>}]} {
    %c0 = arith.constant 0 : index
    %c0_0 = arith.constant 0 : index
    %0 = vector.load %arg2[%c0, %c0_0] : memref<13x27xbf16, #tpu.memory_space<vmem>>, vector<13x27xbf16>
    %c0_1 = arith.constant 0 : index
    %c0_2 = arith.constant 0 : index
    %c0_3 = arith.constant 0 : index
    %1 = vector.load %arg4[%c0_1, %c0_2, %c0_3] : memref<1x27x128xbf16, #tpu.memory_space<vmem>>, vector<1x27x128xbf16>
    %2 = vector.shape_cast %1 : vector<1x27x128xbf16> to vector<27x128xbf16>
    %cst = arith.constant dense<0.000000e+00> : vector<13x128xf32>
    %3 = tpu.matmul %0, %2, %cst {dimension_numbers = #tpu.dot_dimension_numbers<[1], [0], [0], [1], [0, 0, 1, 1], [], []>} : vector<13x27xbf16>, vector<27x128xbf16>, vector<13x128xf32> -> vector<13x128xf32>
    %c0_4 = arith.constant 0 : index
    %c0_5 = arith.constant 0 : index
    %4 = vector.load %arg3[%c0_4, %c0_5] : memref<13x2xf32, #tpu.memory_space<vmem>>, vector<13x1xf32>
    %c0_6 = arith.constant 0 : index
    %c1 = arith.constant 1 : index
    %5 = vector.load %arg3[%c0_6, %c1] : memref<13x2xf32, #tpu.memory_space<vmem>>, vector<13x1xf32>
    %6 = vector.broadcast %4 : vector<13x1xf32> to vector<13x128xf32>
    %7 = arith.addf %3, %6 : vector<13x128xf32>
    %cst_7 = arith.constant 0.000000e+00 : f32
    %8 = vector.broadcast %cst_7 : f32 to vector<13x128xf32>
    %9 = arith.cmpf oge, %7, %8 : vector<13x128xf32>
    %10 = vector.broadcast %5 : vector<13x1xf32> to vector<13x128xf32>
    %11 = arith.mulf %10, %7 : vector<13x128xf32>
    %12 = arith.select %9, %7, %11 : vector<13x128xi1>, vector<13x128xf32>
    %c0_8 = arith.constant 0 : index
    %c0_9 = arith.constant 0 : index
    %c0_10 = arith.constant 0 : index
    %13 = vector.load %arg4[%c0_8, %c0_9, %c0_10] : memref<1x27x128xbf16, #tpu.memory_space<vmem>>, vector<1x27x128xbf16>
    %14 = vector.shape_cast %13 : vector<1x27x128xbf16> to vector<27x128xbf16>
    %15 = vector.extract_strided_slice %14 {offsets = [12, 0], sizes = [3, 128], strides = [1, 1]} : vector<27x128xbf16> to vector<3x128xbf16>
    %16 = vector.extract_strided_slice %14 {offsets = [15, 0], sizes = [3, 128], strides = [1, 1]} : vector<27x128xbf16> to vector<3x128xbf16>
    %17 = arith.maximumf %15, %16 : vector<3x128xbf16>
    %18 = vector.extract_strided_slice %14 {offsets = [21, 0], sizes = [3, 128], strides = [1, 1]} : vector<27x128xbf16> to vector<3x128xbf16>
    %19 = vector.extract_strided_slice %14 {offsets = [24, 0], sizes = [3, 128], strides = [1, 1]} : vector<27x128xbf16> to vector<3x128xbf16>
    %20 = arith.maximumf %18, %19 : vector<3x128xbf16>
    %21 = arith.maximumf %17, %20 : vector<3x128xbf16>
    %22 = arith.extf %21 : vector<3x128xbf16> to vector<3x128xf32>
    %23 = tpu.concatenate %12, %22 in 0 : vector<13x128xf32>, vector<3x128xf32> -> vector<16x128xf32>
    %c0_11 = arith.constant 0 : index
    %c0_12 = arith.constant 0 : index
    %c0_13 = arith.constant 0 : index
    %24 = vector.load %arg5[%c0_11, %c0_12, %c0_13] : memref<1x16x128xf32, #tpu.memory_space<vmem>>, vector<1x16x128xf32>
    %25 = vector.shape_cast %24 : vector<1x16x128xf32> to vector<16x128xf32>
    %26 = vector.shape_cast %23 : vector<16x128xf32> to vector<1x16x128xf32>
    tpu.vector_store %arg5[%c0_11, %c0_12, %c0_13], %26 {strides = array<i32>} : memref<1x16x128xf32, #tpu.memory_space<vmem>>, vector<1x16x128xf32>,
    return
  }
  func.func @transform_0(%arg0: i32, %arg1: i32) -> (i32, i32) {
    %c0_i32 = arith.constant 0 : i32
    %c0_i32_0 = arith.constant 0 : i32
    %c0_i32_1 = arith.constant 0 : i32
    return %c0_i32, %c0_i32_0 : i32, i32
  }
  func.func @transform_1(%arg0: i32, %arg1: i32) -> (i32, i32) {
    %c0_i32 = arith.constant 0 : i32
    %c0_i32_0 = arith.constant 0 : i32
    %c0_i32_1 = arith.constant 0 : i32
    return %c0_i32, %c0_i32_0 : i32, i32
  }
  func.func @transform_2(%arg0: i32, %arg1: i32) -> (i32, i32, i32) {
    %c0_i32 = arith.constant 0 : i32
    %c0_i32_0 = arith.constant 0 : i32
    return %arg0, %c0_i32, %arg1 : i32, i32, i32
  }
  func.func @transform_3(%arg0: i32, %arg1: i32) -> (i32, i32, i32) {
    %c0_i32 = arith.constant 0 : i32
    %c0_i32_0 = arith.constant 0 : i32
    return %arg0, %c0_i32, %arg1 : i32, i32, i32
  }
}

</mosaic_0001>

<bundles_post_ra>
// kernel: initial_block_forward.3
= control target key start
LH: loop header
LB: loop body
LE: loop exit
PB: predicated region body
PF: predicated region fallthrough
CT: control target
= control target key end

     0   :  { %s682_s12 = smov 0   ;;  %s684_s13 = smov 0   ;;  %s796_s0 = inlined_call_operand.vmem [shape: bf16[13,27], index: 0, kind: input, shape index: {}]   ;;  %s797_s1 = inlined_call_operand.vmem [shape: f32[13,2], index: 1, kind: input, shape index: {}]   ;;  %s798_s2 = inlined_call_operand.vmem [shape: bf16[2,27,256], index: 2, kind: input, shape index: {}]   ;;  %s799_s3 = inlined_call_operand.vmem [shape: f32[2,16,256], index: 3, kind: output, shape index: {}]  }
   0x1   :  { %s686_s14 = smov 0   ;;  %s688_s15 = smov 0  }
   0x2   :  { %s690_s16 = smov 0   ;;  %s692_s17 = smov 0  }
   0x3   :  { %s694_s18 = smov 0  }
   0x4 LB: > { %s22_s19 = sadd.s32 1, %s647_s16  ;;  %s25_s20 = sadd.s32 1, %s651_s17  ;;  %s655_s18 = sphi %s694_s18, %s13_s18   ;;  %s651_s17 = sphi %s692_s17, %s806_s17   ;;  %s647_s16 = sphi %s690_s16, %s805_s16   ;;  %s643_s15 = sphi %s688_s15, %s804_s15   ;;  %s639_s14 = sphi %s686_s14, %s803_s14   ;;  %s635_s13 = sphi %s684_s13, %s802_s13   ;;  %s631_s12 = sphi %s682_s12, %s801_s12  }
   0x5   : > { %p23_p0 = scmp.ge.s32.totalorder %s22_s19, 2  ;;  %s503_s21 = sadd.s32 4294967295, %s655_s18  }
   0x6   : > { %p83_p1 = scmp.ne.s32.totalorder %s635_s13, %s631_s12  ;;  %p84_p2 = scmp.eq.s32.totalorder %s655_s18, 0 }
   0x7   : > { %s808_s19 = smov (%p23_p0, %s22_s19), 0  ;;  %s810_s20 = smov (!%p23_p0, %s25_s20), %s651_s17 }
   0x8   : > { %p27_p3 = scmp.ge.s32.totalorder %s810_s20, 2  ;;  %p115_p4 = scmp.eq.s32.totalorder %s503_s21, 3 }
   0x9   : > { %s72_s22 = ssub.s32 %s647_s16, %s808_s19  ;;  %p85_p5 = por %p84_p2, %p83_p1 }
   0xa   : > { %s812_s20 = smov (%p27_p3, %s810_s20), 0  ;;  %p730_p6 = por %p115_p4, %p83_p1 }
   0xb   : > { %s71_s24 = ssub.s32 %s651_s17, %s812_s20  ;;  %s76_s26 = sadd.s32 1, %s635_s13 }
   0xc   : > { %s73_s25 = sor.u32 %s72_s22, %s71_s24  ;;  %p506_p8 = scmp.ge.s32.totalorder %s655_s18, 4 }
   0xd   : > { %p74_p7 = scmp.eq.s32.totalorder %s73_s25, 0 }
   0xe   : > { %143 = sbr.rel (%p506_p8) target bundleno = 29 (0x1d), region = 24 }
   0xf   : > { %s738_s27 = scalar_select %p74_p7, %s635_s13, %s76_s26  }
  0x15   : > { %146 = sbr.rel (!%p85_p5) target bundleno = 29 (0x1d), region = 28  ;;  %s148_s28 = sand.u32 (%p85_p5), 1, %s635_s13  }
  0x16   : > { %s508_s29 = sshll.u32 (%p85_p5), %s651_s17, 3  ;;  %s507_s30 = sshll.u32 (%p85_p5), %s148_s28, 4 }
  0x17   : > { %s152_s4 = sadd.s32 (%p85_p5), %s647_s16, %s508_s29  ;;  %s150_s9 = scalar_lea.vmem (%p85_p5), [#allocation2], %s507_s30 }
  0x18   : > { %s509_s5 = sshll.u32 (%p85_p5), %s152_s4, 2 }
  0x19   : > { %s154_s8 = scalar_lea.vmem (%p85_p5), %s798_s2, %s509_s5 }
  0x1a   : > { %v170_v0 = vld [vmem:[%s154_s8] sm:$0xf] (%p85_p5)  ;;  %v172_v1 = vld [vmem:[%s154_s8 + $0x8] sm:$0xf] (%p85_p5)  ;;  %v174_v2 = vld [vmem:[%s154_s8 + $0x10] sm:$0xf] (%p85_p5) }
  0x1b   : > { %171 = vst [vmem:[%s150_s9] sm:$0xf] (%p85_p5), %v170_v0  ;;  %173 = vst [vmem:[%s150_s9 + $0x4] sm:$0xf] (%p85_p5), %v172_v1  ;;  %v176_v3 = vld [vmem:[%s154_s8 + $0x18] sm:$0xf] (%p85_p5) }
  0x1c   : > { %175 = vst [vmem:[%s150_s9 + $0x8] sm:$0xf] %v174_v2  ;;  %177 = vst [vmem:[%s150_s9 + $0xc] sm:$0xf] %v176_v3 }
  0x1d PF: > { %p510_p9 = scmp.ge.s32.totalorder %s655_s18, 1  ;;  %p207_p10 = scmp.lt.s32.totalorder %s655_s18, 5 }
  0x1f   : > { %p208_p11 = pnand %p510_p9, %p207_p10 }
  0x20   : > { %s214_s10 = sand.u32 (!%p208_p11), 1, %s631_s12   ;;  %vm337_vm0 = vsmask.f32 (!%p208_p11), 2304  ;;  %vm338_vm1 = vsmask.f32 (!%p208_p11), 6416  ;;  %v657_v4 = vmov (!%p208_p11), 0.0  }
  0x21   : > { %211 = sbr.rel (%p208_p11) target bundleno = 274 (0x112), region = 69  ;;  %526 = vmatprep.subr.bf16.mxu0 (!%p208_p11), %v657_v4  ;;  %s750_s11 = sshll.u32 (!%p208_p11), %s214_s10, 4  ;;  %vm275_vm2 = vcmask (!%p208_p11), 1044480   ;;  %vm276_vm3 = vcmask (!%p208_p11), 1045504   ;;  %v658_v5 = vmov (!%p208_p11), 65535   ;;  %vm659_vm4 = vmmov (!%p208_p11), 0   ;;  %vm339_vm5 = vmor (!%p208_p11), %vm337_vm0, %vm338_vm1 }
  0x22   : > { %v277_v6 = vsel (!%p208_p11), %vm275_vm2, 4294967295, %v658_v5  ;;  %530 = vmatprep.mubr.msk.bf16.mxu0 (!%p208_p11), %vm659_vm4, %v657_v4  ;;  %s216_s21 = scalar_lea.vmem (!%p208_p11), [#allocation2], %s750_s11  ;;  %v244_v22 = vld [vmem:[%s797_s1 + $0x8] sm:$0x1f] (!%p208_p11)  ;;  %v660_v27 = vmov (!%p208_p11), 0   ;;  %v661_v30 = vmov (!%p208_p11), 1  }
  0x23   : > { %v239_v7 = vld [vmem:[%s216_s21] sm:$0xf] (!%p208_p11)  ;;  %v240_v8 = vld [vmem:[%s216_s21 + $0x4] sm:$0xf] (!%p208_p11)  ;;  %v241_v9 = vld [vmem:[%s216_s21 + $0x8] sm:$0xf] (!%p208_p11)  ;;  %595 = vset.pattern.permute.xlu0 (!%p208_p11), %v660_v27  ;;  %596 = vset.pattern.permute.xlu1 (!%p208_p11), %v661_v30 }
  0x24   : > { %v242_v10 = vld [vmem:[%s216_s21 + $0xc] sm:$0x3] (!%p208_p11)  ;;  %v514_v11 = vcombine.low (!%p208_p11), %v239_v7, %v240_v8  ;;  %v341_v12 = vshrl.u32 (!%p208_p11), %v240_v8, 16  ;;  %v346_v13 = vshrl.u32 (!%p208_p11), %v241_v9, 16  ;;  %v349_v14 = vshll.u32 (!%p208_p11), %v241_v9, 16  ;;  %252 = vperm.xlu0 (!%p208_p11), %595, %v244_v22   ;;  %330 = vperm.xlu1 (!%p208_p11), %596, %v244_v22   ;;  %v243_v32 = vld [vmem:[%s797_s1] sm:$0xff] (!%p208_p11) }
  0x25   : > { %v357_v15 = vshrl.u32 (!%p208_p11), %v242_v10, 16  ;;  %v360_v16 = vshll.u32 (!%p208_p11), %v242_v10, 16  ;;  %v515_v17 = vcombine.low (!%p208_p11), %v241_v9, %v242_v10  ;;  %v278_v18 = vsel (!%p208_p11), %vm276_vm3, %v277_v6, 0  ;;  %v600_v29 = vld [vmem:[%s796_s0] sm:$0x7f] (!%p208_p11)   ;;  %s235_s29 = scalar_lea.vmem (!%p208_p11), [#allocation3], %s750_s11 }
  0x26   : > { %527 = vmatpush3.bf16.msra.mxu0 (!%p208_p11), %v514_v11  ;;  %v517_v19 = vrot.slane (!%p208_p11), %v341_v12, 9  ;;  %v348_v20 = vrot.slane (!%p208_p11), %v346_v13, 5  ;;  %v351_v21 = vrot.slane (!%p208_p11), %v349_v14, 6  ;;  %vm271_vm6 = vcmask (!%p208_p11), 220160  }
  0x27   : > { %v359_v23 = vrot.slane (!%p208_p11), %v357_v15, 5  ;;  %v362_v24 = vrot.slane (!%p208_p11), %v360_v16, 6  ;;  %528 = vmatprep.subr.bf16.mxu0 (!%p208_p11), %v657_v4  ;;  %v280_v25 = vand.u32 (!%p208_p11), %v515_v17, %v278_v18 }
  0x28   : > { %v352_v26 = vor.u32 %v351_v21, %v348_v20  ;;  %247 = vperm.xlu0 %595, %v243_v32   ;;  %326 = vperm.xlu1 %596, %v243_v32   ;;  %s519_s30 = sshll.u32 (%p730_p6), %s643_s15, 2 }
  0x29   : > { %v363_v28 = vor.u32 %v362_v24, %v359_v23  ;;  %s392_s4 = sadd.s32 (%p730_p6), %s639_s14, %s519_s30 }
  0x2a   : > { %v353_v31 = vsel %vm339_vm5, %v517_v19, %v352_v26  ;;  %529 = vmatpush3.bf16.msra.mxu0 %v280_v25  ;;  %s520_s5 = sshll.u32 (%p730_p6), %s392_s4, 3 }
  0x2b   : > { %v355_v33 = vmax.bf16 %v353_v31, %v240_v8  ;;  %v365_v34 = vmax.bf16 %v363_v28, %v241_v9  ;;  %s394_s8 = scalar_lea.vmem (%p730_p6), %s799_s3, %s520_s5 }
  0x2c   : > { %597 = vset.pattern.permute.xlu0 %v661_v30 }
  0x2d   : > { %v367_v35 = vshrl.u32 %v365_v34, 16  ;;  %v370_v36 = vshll.u32 %v365_v34, 16  ;;  %531 = vmatmul.mubr.msk.bf16.vlgmr.msra.gmra.mrb[0].mxu0 %vm271_vm6, %v600_v29 }
  0x2f   : > { %v369_v37 = vrot.slane %v367_v35, 4  ;;  %v372_v38 = vrot.slane %v370_v36, 5 }
  0x31   : > { %v373_v39 = vor.u32 %v372_v38, %v369_v37 }
  0x33   : > { %v374_v40 = vrot.slane %v373_v39, 4 }
  0x35   : > { %v376_v41 = vmax.bf16 %v374_v40, %v355_v33 }
  0x37   : > { %v377_v45 = vunpack.c.l.bf16 %v376_v41 }
  0x39   : > { %v379_v54 = vrot.slane %v377_v45, 7 }
  0xa3   : > { %v253_v42 = vpop.permute.xlu0 %252  ;;  %v331_v43 = vpop.permute.xlu1 %330 }
  0xa7   : > { %v248_v44 = vpop.permute.xlu0 %247  ;;  %v327_v47 = vpop.permute.xlu1 %326 }
 0x100   : > { %v316_v46 = vpop.f32.mrb[0].mxu0 }
 0x101   : > { %v317_v48 = vadd.f32 %v316_v46, %v248_v44  ;;  %v532_v49 = vpop.f32.mrb[1].mxu0 }
 0x102   : > { %v319_v50 = vpop.f32.mrb[2].mxu0 }
 0x103   : > { %vm323_vm7 = vcmp.ge.f32.partialorder %v317_v48, 0.0  ;;  %v333_v51 = vmul.f32 %v327_v47, %v317_v48  ;;  %v320_v52 = vadd.f32 %v319_v50, %v253_v42  ;;  %v533_v53 = vpop.f32.mrb[3].mxu0  ;;  %390 = sbr.rel (!%p730_p6) target bundleno = 274 (0x112), region = 77 }
 0x105   : > { %v335_v55 = vsel %vm323_vm7, %v317_v48, %v333_v51  ;;  %vm324_vm8 = vcmp.ge.f32.partialorder %v320_v52, 0.0  ;;  %v334_v56 = vmul.f32 %v331_v43, %v320_v52 }
 0x106   : > { %382 = vst [vmem:[%s235_s29] sm:$0xff] %v335_v55 }
 0x107   : > { %v336_v57 = vsel %vm324_vm8, %v320_v52, %v334_v56 }
 0x108   : > { %v381_v58 = vsel %vm275_vm2, %v336_v57, %v379_v54 }
 0x109   : > { %383 = vst [vmem:[%s235_s29 + $0x8] sm:$0xff] %v381_v58 }
 0x10d   : > { %v424_v59 = vld [vmem:[%s235_s29] sm:$0xff] }
 0x10e   : > { %425 = vst [vmem:[%s394_s8] sm:$0xff] %v424_v59 }
 0x110   : > { %v426_v60 = vld [vmem:[%s235_s29 + $0x8] sm:$0xff] }
 0x111   : > { %427 = vst [vmem:[%s394_s8 + $0x10] sm:$0xff] %v426_v60 }
 0x112 PF: > { %s13_s18 = sadd.s32 1, %s655_s18   ;;  %s801_s12 = smov %s635_s13 }
 0x113   : > { %p10_p12 = scmp.ge.s32.totalorder %s13_s18, 6   ;;  %s802_s13 = smov %s738_s27 }
 0x114   : > { %s803_s14 = smov %s647_s16  ;;  %s804_s15 = smov %s651_s17 }
 0x115   : > { %s805_s16 = smov %s808_s19  ;;  %s806_s17 = smov %s812_s20 }
 0x116   :  { %12 = sbr.rel (!%p10_p12) target bundleno = 4 (0x4), region = 146 }

// kernel: initial_block_forward.2
= control target key start
LH: loop header
LB: loop body
LE: loop exit
PB: predicated region body
PF: predicated region fallthrough
CT: control target
= control target key end

     0   :  { %s751_s12 = smov 0   ;;  %s753_s13 = smov 0   ;;  %s893_s0 = inlined_call_operand.vmem [shape: bf16[13,27], index: 0, kind: input, shape index: {}]   ;;  %s894_s1 = inlined_call_operand.vmem [shape: bf16[2,27,256], index: 1, kind: input, shape index: {}]   ;;  %s895_s2 = inlined_call_operand.vmem [shape: f32[13,512], index: 2, kind: output, shape index: {0}]   ;;  %s896_s3 = inlined_call_operand.vmem [shape: f32[13,512], index: 3, kind: output, shape index: {1}]  }
   0x1   :  { %s755_s14 = smov 0   ;;  %s757_s15 = smov 0  }
   0x2   :  { %s759_s16 = smov 0   ;;  %s761_s17 = smov 0  }
   0x3   :  { %s763_s18 = smov 0   ;;  %s765_s19 = smov 0  }
   0x4   :  { %s767_s20 = smov 0  }
   0x5 LB: > { %s540_s21 = sadd.s32 4294967295, %s726_s20   ;;  %s23_s22 = sadd.s32 1, %s718_s18  ;;  %s726_s20 = sphi %s767_s20, %s14_s20   ;;  %s722_s19 = sphi %s765_s19, %s906_s19   ;;  %s718_s18 = sphi %s763_s18, %s905_s18   ;;  %s714_s17 = sphi %s761_s17, %s904_s17   ;;  %s710_s16 = sphi %s759_s16, %s903_s16   ;;  %s706_s15 = sphi %s757_s15, %s902_s15   ;;  %s702_s14 = sphi %s755_s14, %s901_s14   ;;  %s698_s13 = sphi %s753_s13, %s900_s13   ;;  %s694_s12 = sphi %s751_s12, %s899_s12  }
   0x6   : > { %p24_p0 = scmp.ge.s32.totalorder %s23_s22, 2  ;;  %s26_s23 = sadd.s32 1, %s722_s19 }
   0x7   : > { %s56_s24 = sadd.s32 1, %s706_s15  ;;  %p63_p1 = scmp.ne.s32.totalorder %s706_s15, %s702_s14 }
   0x8   : > { %s908_s22 = smov (%p24_p0, %s23_s22), 0  ;;  %s910_s23 = smov (!%p24_p0, %s26_s23), %s722_s19 }
   0x9   : > { %s52_s25 = ssub.s32 %s718_s18, %s908_s22  ;;  %p64_p2 = scmp.eq.s32.totalorder %s726_s20, 0 }
   0xa   : > { %p28_p3 = scmp.ge.s32.totalorder %s910_s23, 2  ;;  %s542_s26 = sshll.u32 %s722_s19, 1 }
   0xb   : > { %p809_p4 = por %p64_p2, %p63_p1  ;;  %s80_s28 = sadd.s32 %s718_s18, %s542_s26 }
   0xc   : > { %s912_s23 = smov (%p28_p3, %s910_s23), 0  ;;  %s86_s29 = sadd.s32 1, %s698_s13 }
   0xd   : > { %p96_p5 = scmp.ne.s32.totalorder %s698_s13, %s694_s12  ;;  %s51_s30 = ssub.s32 %s722_s19, %s912_s23 }
   0xe   : > { %s543_s4 = sshll.u32 %s912_s23, 1  ;;  %s53_s5 = sor.u32 %s52_s25, %s51_s30 }
   0xf   : > { %s82_s6 = sadd.s32 %s543_s4, %s908_s22  ;;  %p54_p6 = scmp.eq.s32.totalorder %s53_s5, 0 }
  0x10   : > { %s83_s7 = ssub.s32 %s80_s28, %s82_s6  ;;  %p97_p8 = scmp.eq.s32.totalorder %s540_s21, 3 }
  0x11   : > { %p84_p7 = scmp.eq.s32.totalorder %s83_s7, 0  ;;  %p547_p10 = scmp.ge.s32.totalorder %s726_s20, 4 }
  0x12   : > { %s824_s8 = scalar_select %p54_p6, %s706_s15, %s56_s24  }
  0x13   : > { %s827_s9 = scalar_select %p84_p7, %s698_s13, %s86_s29  }
  0x14   : > { %p829_p9 = por %p97_p8, %p96_p5  ;;  %152 = sbr.rel (%p547_p10) target bundleno = 35 (0x23), region = 20 }
  0x1b   : > { %155 = sbr.rel (!%p809_p4) target bundleno = 35 (0x23), region = 24  ;;  %s157_s11 = sand.u32 (%p809_p4), 1, %s706_s15  }
  0x1c   : > { %s549_s25 = sshll.u32 (%p809_p4), %s722_s19, 3  ;;  %s548_s21 = sshll.u32 (%p809_p4), %s157_s11, 4 }
  0x1d   : > { %s161_s24 = sadd.s32 (%p809_p4), %s718_s18, %s549_s25  ;;  %s159_s4 = scalar_lea.vmem (%p809_p4), [#allocation2], %s548_s21 }
  0x1e   : > { %s550_s26 = sshll.u32 (%p809_p4), %s161_s24, 2 }
  0x1f   : > { %s163_s30 = scalar_lea.vmem (%p809_p4), %s894_s1, %s550_s26 }
  0x20   : > { %v179_v0 = vld [vmem:[%s163_s30] sm:$0xf] (%p809_p4)  ;;  %v181_v1 = vld [vmem:[%s163_s30 + $0x8] sm:$0xf] (%p809_p4)  ;;  %v183_v2 = vld [vmem:[%s163_s30 + $0x10] sm:$0xf] (%p809_p4) }
  0x21   : > { %180 = vst [vmem:[%s159_s4] sm:$0xf] (%p809_p4), %v179_v0  ;;  %182 = vst [vmem:[%s159_s4 + $0x4] sm:$0xf] (%p809_p4), %v181_v1  ;;  %v185_v3 = vld [vmem:[%s163_s30 + $0x18] sm:$0xf] (%p809_p4) }
  0x22   : > { %184 = vst [vmem:[%s159_s4 + $0x8] sm:$0xf] %v183_v2  ;;  %186 = vst [vmem:[%s159_s4 + $0xc] sm:$0xf] %v185_v3 }
  0x23 PF: > { %p551_p11 = scmp.ge.s32.totalorder %s726_s20, 1  ;;  %p216_p12 = scmp.lt.s32.totalorder %s726_s20, 5 }
  0x25   : > { %p217_p13 = pnand %p551_p11, %p216_p12 }
  0x26   : > { %s223_s27 = sand.u32 (!%p217_p13), 1, %s702_s14   ;;  %vm280_vm0 = vcmask (!%p217_p13), 1044480   ;;  %vm281_vm1 = vcmask (!%p217_p13), 1045504   ;;  %v728_v4 = vmov (!%p217_p13), 0.0   ;;  %v729_v5 = vmov (!%p217_p13), 65535   ;;  %s240_s14 = sand.u32 (!%p217_p13), 1, %s694_s12  }
  0x27   : > { %220 = sbr.rel (%p217_p13) target bundleno = 424 (0x1a8), region = 65  ;;  %570 = vmatprep.subr.bf16.mxu0 (!%p217_p13), %v728_v4  ;;  %s552_s5 = sshll.u32 (!%p217_p13), %s223_s27, 4  ;;  %v282_v6 = vsel (!%p217_p13), %vm280_vm0, 4294967295, %v729_v5  ;;  %vm730_vm2 = vmmov (!%p217_p13), 0   ;;  %v655_v11 = vld [vmem:[%s893_s0] sm:$0x7f] (!%p217_p13)  }
  0x28   : > { %574 = vmatprep.mubr.msk.bf16.mxu0 (!%p217_p13), %vm730_vm2, %v728_v4  ;;  %s225_s6 = scalar_lea.vmem (!%p217_p13), [#allocation2], %s552_s5  ;;  %v283_v8 = vsel (!%p217_p13), %vm281_vm1, %v282_v6, 0  ;;  %vm276_vm3 = vcmask (!%p217_p13), 220160   ;;  %s553_s25 = sshll.u32 (!%p217_p13), %s240_s14, 4 }
  0x29   : > { %v653_v7 = vld [vmem:[%s225_s6] sm:$0xff] (!%p217_p13)   ;;  %v654_v9 = vld [vmem:[%s225_s6 + $0x8] sm:$0x3f] (!%p217_p13)   ;;  %s242_s21 = scalar_lea.vmem (!%p217_p13), [#allocation3], %s553_s25  ;;  %s248_s24 = scalar_lea.vmem (!%p217_p13), [#allocation4], %s553_s25 }
  0x2a   : > { %571 = vmatpush3.bf16.msra.mxu0 (!%p217_p13), %v653_v7  ;;  %v285_v10 = vand.u32 (!%p217_p13), %v654_v9, %v283_v8 }
  0x2b   : > { %572 = vmatprep.subr.bf16.mxu0 (!%p217_p13), %v728_v4 }
  0x2e   : > { %573 = vmatpush3.bf16.msra.mxu0 %v285_v10  ;;  %s561_s26 = sshll.u32 (%p829_p9), %s714_s17, 1 }
  0x2f   : > { %s356_s28 = sadd.s32 (%p829_p9), %s710_s16, %s561_s26 }
  0x30   : > { %s562_s12 = sshll.u32 (%p829_p9), %s356_s28, 3 }
  0x31   : > { %575 = vmatmul.mubr.msk.bf16.vlgmr.msra.gmra.mrb[0].mxu0 %vm276_vm3, %v655_v11  ;;  %s358_s4 = scalar_lea.vmem (%p829_p9), %s895_s2, %s562_s12 }
 0x104   : > { %v321_v12 = vpop.f32.mrb[0].mxu0 }
 0x105   : > { %328 = vadd.xlane.f32.xlu0 %v321_v12  ;;  %v576_v13 = vpop.f32.mrb[1].mxu0  ;;  %v333_v14 = vmul.f32 %v321_v12, %v321_v12 }
 0x106   : > { %v324_v15 = vpop.f32.mrb[2].mxu0 }
 0x107   : > { %v334_v16 = vmul.f32 %v324_v15, %v324_v15  ;;  %335 = vadd.xlane.f32.xlu1 %v333_v14  ;;  %v577_v17 = vpop.f32.mrb[3].mxu0  ;;  %v330_v18 = vsel %vm280_vm0, %v324_v15, 0.0 }
 0x109   : > { %331 = vadd.xlane.f32.xlu0 %v330_v18  ;;  %v337_v19 = vsel %vm280_vm0, %v334_v16, 0.0 }
 0x10b   : > { %338 = vadd.xlane.f32.xlu1 %v337_v19 }
 0x192   : > { %v329_v20 = vpop.xlane.xlu0 %328 }
 0x193   : > { %340 = vst [vmem:[%s242_s21] sm:$0xff] %v329_v20  ;;  %354 = sbr.rel (!%p829_p9) target bundleno = 416 (0x1a0), region = 73 }
 0x194   : > { %v336_v21 = vpop.xlane.xlu1 %335 }
 0x195   : > { %342 = vst [vmem:[%s248_s24] sm:$0xff] %v336_v21 }
 0x196   : > { %v332_v22 = vpop.xlane.xlu0 %331 }
 0x197   : > { %341 = vst [vmem:[%s242_s21 + $0x8] sm:$0x1f] %v332_v22 }
 0x198   : > { %v339_v23 = vpop.xlane.xlu1 %338 }
 0x199   : > { %343 = vst [vmem:[%s248_s24 + $0x8] sm:$0x1f] %v339_v23 }
 0x19a   : > { %v388_v24 = vld [vmem:[%s242_s21] sm:$0xff] }
 0x19b   : > { %389 = vst [vmem:[%s358_s4] sm:$0xff] %v388_v24 }
 0x19e   : > { %v390_v25 = vld [vmem:[%s242_s21 + $0x8] sm:$0xff] }
 0x19f   : > { %391 = vst [vmem:[%s358_s4 + $0x20] sm:$0xff] %v390_v25 }
 0x1a0 PF: > { %397 = sbr.rel (!%p829_p9) target bundleno = 424 (0x1a8), region = 111  ;;  %s563_s27 = sshll.u32 (%p829_p9), %s714_s17, 1 }
 0x1a1   : > { %s399_s5 = sadd.s32 (%p829_p9), %s710_s16, %s563_s27 }
 0x1a2   : > { %v431_v26 = vld [vmem:[%s248_s24] sm:$0xff] (%p829_p9)  ;;  %s564_s6 = sshll.u32 (%p829_p9), %s399_s5, 3 }
 0x1a3   : > { %s401_s14 = scalar_lea.vmem (%p829_p9), %s896_s3, %s564_s6 }
 0x1a4   : > { %432 = vst [vmem:[%s401_s14] sm:$0xff] (%p829_p9), %v431_v26 }
 0x1a6   : > { %v433_v27 = vld [vmem:[%s248_s24 + $0x8] sm:$0xff] (%p829_p9) }
 0x1a7   : > { %434 = vst [vmem:[%s401_s14 + $0x20] sm:$0xff] %v433_v27 }
 0x1a8 PF: > { %s14_s20 = sadd.s32 1, %s726_s20   ;;  %s899_s12 = smov %s698_s13 }
 0x1a9   : > { %p11_p0 = scmp.ge.s32.totalorder %s14_s20, 6   ;;  %s900_s13 = smov %s827_s9 }
 0x1aa   : > { %s901_s14 = smov %s706_s15  ;;  %s902_s15 = smov %s824_s8 }
 0x1ab   : > { %s903_s16 = smov %s718_s18  ;;  %s904_s17 = smov %s722_s19 }
 0x1ac   : > { %s905_s18 = smov %s908_s22  ;;  %s906_s19 = smov %s912_s23 }
 0x1ad   :  { %13 = sbr.rel (!%p11_p0) target bundleno = 5 (0x5), region = 192 }

</bundles_post_ra>
